<compile_context>
chip_gen: v7x
topology: tpu7x:2x2x1
jax: 0.10.0
libtpu: 0.0.40
codegen_flags: <defaults>
</compile_context>

<pallas_src>
import functools

import jax
import jax.numpy as jnp
from jax.experimental import pallas as pl
from jax.experimental.pallas import tpu as pltpu


def _tile_lanes(piece, reps, width):
    """Tile `piece` ((b, width)) `reps` times along lanes via doubling concats."""
    out = piece
    have = 1
    while have * 2 <= reps:
        out = jnp.concatenate([out, out], axis=-1)
        have *= 2
    if have < reps:
        out = jnp.concatenate([out, out[:, : (reps - have) * width]], axis=-1)
    return out


def _window_sum_doubling(w, kernel_size, C, L_padded, L_dense):
    """w: (b, L_padded*C) f32 value holding W_1 (the padded sequence).

    Returns W_{kernel_size}[t] for t = 0..L_dense-1 as a (b, L_dense*C) value,
    built by binary doubling:  W_{2m}[t] = W_m[t] + W_m[t+m]  and combining the
    power-of-two levels selected by the bits of kernel_size.
    """
    acc = None
    s = 0          # window length accumulated in acc
    m = 1          # window length held in w (a power of two)
    while True:
        if kernel_size & m:
            if acc is None:
                acc, s = w, m
            else:
                n = L_padded - (s + m) + 1
                acc = acc[:, : n * C] + w[:, s * C:(s + n) * C]
                s += m
        if 2 * m > kernel_size:
            break
        n2 = L_padded - 2 * m + 1
        w = w[:, : n2 * C] + w[:, m * C:(m + n2) * C]
        m *= 2
    return acc[:, : L_dense * C]


def _moving_avg_kernel(x_ref, o_ref, *, kernel_size, pad, L, C, L_dense):
    # x_ref: (b_tile, L*C) lane-dense input block.  o_ref: (b_tile, L_dense*C).
    x = x_ref[...]
    if pad > 0:
        front = _tile_lanes(x[:, :C], pad, C)                # replicate x[:, 0]
        end = _tile_lanes(x[:, (L - 1) * C:], pad, C)        # replicate x[:, L-1]
        xp = jnp.concatenate([front, x, end], axis=-1)       # (b, (L+2*pad)*C)
    else:
        xp = x
    acc = _window_sum_doubling(
        xp.astype(jnp.float32), kernel_size, C, L + 2 * pad, L_dense)
    o_ref[...] = (acc * (1.0 / kernel_size)).astype(o_ref.dtype)


def _moving_avg_kernel_scratch(x_ref, o_ref, xpad_ref, *,
                               kernel_size, pad, L, C, L_dense):
    # Fallback: padded sequence staged through a VMEM scratch (the previously
    # proven lowering path); same doubling accumulation as the primary kernel.
    xpad_ref[:, pl.ds(pad * C, L * C)] = x_ref[...]
    if pad > 0:
        first = x_ref[:, 0:C]
        last = x_ref[:, (L - 1) * C: L * C]
        for p in range(pad):
            xpad_ref[:, pl.ds(p * C, C)] = first
            xpad_ref[:, pl.ds((pad + L + p) * C, C)] = last
    w = xpad_ref[...].astype(jnp.float32)
    acc = _window_sum_doubling(w, kernel_size, C, L + 2 * pad, L_dense)
    o_ref[...] = (acc * (1.0 / kernel_size)).astype(o_ref.dtype)


def _tpu_query():
    """Best-effort (VMEM capacity bytes, tensorcores per chip); None if unknown."""
    vmem_cap, n_cores = None, None
    try:
        info = pltpu.get_tpu_info()
        cap = getattr(info, "vmem_capacity_bytes", None)
        if isinstance(cap, int) and cap > 0:
            vmem_cap = cap
        for name in ("num_cores", "core_count", "num_tensorcores", "cores_per_chip"):
            v = getattr(info, name, None)
            if isinstance(v, int) and v > 0:
                n_cores = v
                break
    except Exception:
        pass
    return vmem_cap, n_cores


def _pick_b_tile(B, row_bytes, budget_bytes, min_blocks):
    fit = max(1, budget_bytes // max(row_bytes, 1))
    t = min(B, int(fit))
    if B >= 16 and min_blocks > 1:
        # Guarantee >= min_blocks "parallel" grid steps (v7x megacore) when the
        # batch is large enough to split at 8-row granularity.
        t = min(t, pl.cdiv(B, min_blocks))
    if t >= B:
        return B
    t = (t // 8) * 8               # block second-minor dim: multiple of 8
    if t < 8:
        t = 8
    return min(t, B)


def moving_avg(x, kernel_size, stride, b_tile=None):
    """x: (B, L, C) float array.  Returns (B, L_out, C), matching PyTorch."""
    B, L, C = x.shape
    pad = (kernel_size - 1) // 2
    L_pad = L + 2 * pad
    L_dense = L_pad - kernel_size + 1                 # number of stride-1 windows
    L_out = (L_pad - kernel_size) // stride + 1

    # Free, layout-preserving reshape: the minor (lane) axis becomes L*C.
    x_flat = x.reshape(B, L * C)

    itemsize = jnp.dtype(x.dtype).itemsize
    # Per-row working set: double-buffered in/out blocks + live f32 value arrays
    # (padded sequence / doubling partial sums) Mosaic keeps in vregs/VMEM.
    row_bytes = 2 * (L * C + L_dense * C) * itemsize + 3 * L_pad * C * 4

    vmem_cap, n_cores = _tpu_query()
    budget = 8 << 20
    if vmem_cap:
        budget = min(max(budget, vmem_cap // 8), 24 << 20)
    min_blocks = n_cores if (n_cores and n_cores >= 2) else 2

    if b_tile is None:
        b_tile = _pick_b_tile(B, row_bytes, budget, min_blocks)
    grid_b = pl.cdiv(B, b_tile)

    est = b_tile * row_bytes
    vmem_limit = int(min(max(est * 3 // 2 + (2 << 20), 24 << 20), 56 << 20))
    if vmem_cap:
        vmem_limit = min(vmem_limit, vmem_cap * 7 // 8)

    def build(use_scratch):
        kern_fn = _moving_avg_kernel_scratch if use_scratch else _moving_avg_kernel
        kern = functools.partial(
            kern_fn, kernel_size=kernel_size, pad=pad, L=L, C=C, L_dense=L_dense)
        scratch = [pltpu.VMEM((b_tile, L_pad * C), x.dtype)] if use_scratch else []
        return pl.pallas_call(
            kern,
            out_shape=jax.ShapeDtypeStruct((B, L_dense * C), x.dtype),
            grid_spec=pltpu.PrefetchScalarGridSpec(
                num_scalar_prefetch=0,
                grid=(grid_b,),
                in_specs=[pl.BlockSpec((b_tile, L * C), lambda b: (b, 0))],
                out_specs=pl.BlockSpec((b_tile, L_dense * C), lambda b: (b, 0)),
                scratch_shapes=scratch,
            ),
            compiler_params=pltpu.CompilerParams(
                dimension_semantics=("parallel",),
                vmem_limit_bytes=vmem_limit,
            ),
        )

    try:
        out_flat = build(use_scratch=False)(x_flat)
    except Exception:
        # Fallback if this Mosaic build rejects unaligned minor-dim concatenate.
        out_flat = build(use_scratch=True)(x_flat)

    out = out_flat.reshape(B, L_dense, C)
    if stride != 1:
        # DLinear uses stride=1; for general AvgPool1d strides we subsample the
        # dense windows so all in-kernel slices stay unit-stride.
        # TODO(synk): a stride-aware output index_map would avoid writing the
        # extra dense windows for stride > 1 (never hit by DLinear).
        out = out[:, ::stride, :][:, :L_out, :]
    return out


def _reference(x, kernel_size, stride):
    # Pure-JAX reference of the PyTorch module for correctness checking.
    B, L, C = x.shape
    pad = (kernel_size - 1) // 2
    front = jnp.repeat(x[:, 0:1, :], pad, axis=1)
    end = jnp.repeat(x[:, L - 1:L, :], pad, axis=1)
    xp = jnp.concatenate([front, x, end], axis=1)
    L_pad = L + 2 * pad
    L_out = (L_pad - kernel_size) // stride + 1
    idx = jnp.arange(L_out) * stride
    windows = jnp.stack(
        [xp[:, idx + k, :] for k in range(kernel_size)], axis=0
    )  # (K, B, L_out, C)
    return jnp.mean(windows, axis=0)


if __name__ == "__main__":
    key = jax.random.PRNGKey(0)

    # (B, L, C, kernel_size, stride, dtype, forced b_tile)
    cases = [
        (2, 16, 8, 5, 1, jnp.float32, None),    # small DLinear-style shape
        (2, 48, 8, 25, 1, jnp.float32, None),   # DLinear default kernel_size
        (2, 16, 8, 5, 2, jnp.float32, None),    # strided pooling path
        (2, 16, 7, 25, 1, jnp.float32, None),   # odd channel count (7 variates)
        (10, 16, 8, 5, 1, jnp.float32, 8),      # multi-block grid + ragged tail
        (2, 16, 8, 5, 1, jnp.bfloat16, None),   # low-precision input path
    ]

    for i, (B, L, C, ks, st, dtype, bt) in enumerate(cases):
        key, sub = jax.random.split(key)
        x = jax.random.normal(sub, (B, L, C), dtype=jnp.float32)
        y = jax.block_until_ready(moving_avg(x.astype(dtype), ks, st, b_tile=bt))
        y_ref = _reference(x, ks, st)
        assert y.shape == y_ref.shape, (i, y.shape, y_ref.shape)
        tol = 1e-5 if dtype == jnp.float32 else 2e-2
        err = float(jnp.max(jnp.abs(y.astype(jnp.float32) - y_ref)))
        assert jnp.allclose(y.astype(jnp.float32), y_ref, atol=tol, rtol=tol), (i, err)

    print("KERNEL_OK")
</pallas_src>

<mosaic_0001>
module attributes {stable_mosaic.version = 11 : i64} {
  func.func @_moving_avg_kernel(%arg0: i32, %arg1: memref<2x128xf32, #tpu.memory_space<vmem>>, %arg2: memref<2x128xf32, #tpu.memory_space<vmem>>) attributes {dimension_semantics = [#tpu.dimension_semantics<parallel>], iteration_bounds = array<i64: 1>, scalar_prefetch = 0 : i64, scratch_operands = 0 : i64, tpu.core_type = #tpu.core_type<tc>, window_params = [{transform_indices = @transform_0, window_bounds = array<i64: 2, 128>}, {transform_indices = @transform_1, window_bounds = array<i64: 2, 128>}]} {
    %c0 = arith.constant 0 : index
    %c0_0 = arith.constant 0 : index
    %0 = vector.load %arg1[%c0, %c0_0] : memref<2x128xf32, #tpu.memory_space<vmem>>, vector<2x128xf32>
    %1 = vector.extract_strided_slice %0 {offsets = [0, 0], sizes = [2, 8], strides = [1, 1]} : vector<2x128xf32> to vector<2x8xf32>
    %2 = tpu.concatenate %1, %1 in 1 : vector<2x8xf32>, vector<2x8xf32> -> vector<2x16xf32>
    %3 = vector.extract_strided_slice %0 {offsets = [0, 120], sizes = [2, 8], strides = [1, 1]} : vector<2x128xf32> to vector<2x8xf32>
    %4 = tpu.concatenate %3, %3 in 1 : vector<2x8xf32>, vector<2x8xf32> -> vector<2x16xf32>
    %5 = tpu.concatenate %2, %0, %4 in 1 : vector<2x16xf32>, vector<2x128xf32>, vector<2x16xf32> -> vector<2x160xf32>
    %6 = vector.extract_strided_slice %5 {offsets = [0, 0], sizes = [2, 152], strides = [1, 1]} : vector<2x160xf32> to vector<2x152xf32>
    %7 = vector.extract_strided_slice %5 {offsets = [0, 8], sizes = [2, 152], strides = [1, 1]} : vector<2x160xf32> to vector<2x152xf32>
    %8 = arith.addf %6, %7 : vector<2x152xf32>
    %9 = vector.extract_strided_slice %8 {offsets = [0, 0], sizes = [2, 136], strides = [1, 1]} : vector<2x152xf32> to vector<2x136xf32>
    %10 = vector.extract_strided_slice %8 {offsets = [0, 16], sizes = [2, 136], strides = [1, 1]} : vector<2x152xf32> to vector<2x136xf32>
    %11 = arith.addf %9, %10 : vector<2x136xf32>
    %12 = vector.extract_strided_slice %5 {offsets = [0, 0], sizes = [2, 128], strides = [1, 1]} : vector<2x160xf32> to vector<2x128xf32>
    %13 = vector.extract_strided_slice %11 {offsets = [0, 8], sizes = [2, 128], strides = [1, 1]} : vector<2x136xf32> to vector<2x128xf32>
    %14 = arith.addf %12, %13 : vector<2x128xf32>
    %cst = arith.constant 2.000000e-01 : f32
    %15 = vector.broadcast %cst : f32 to vector<2x128xf32>
    %16 = arith.mulf %14, %15 : vector<2x128xf32>
    %c0_1 = arith.constant 0 : index
    %c0_2 = arith.constant 0 : index
    %17 = vector.load %arg2[%c0_1, %c0_2] : memref<2x128xf32, #tpu.memory_space<vmem>>, vector<2x128xf32>
    tpu.vector_store %arg2[%c0_1, %c0_2], %16 {strides = array<i32>} : memref<2x128xf32, #tpu.memory_space<vmem>>, vector<2x128xf32>,
    return
  }
  func.func @transform_0(%arg0: i32) -> (i32, i32) {
    %c0_i32 = arith.constant 0 : i32
    %c0_i32_0 = arith.constant 0 : i32
    return %arg0, %c0_i32 : i32, i32
  }
  func.func @transform_1(%arg0: i32) -> (i32, i32) {
    %c0_i32 = arith.constant 0 : i32
    %c0_i32_0 = arith.constant 0 : i32
    return %arg0, %c0_i32 : i32, i32
  }
}

module attributes {stable_mosaic.version = 11 : i64} {
  func.func @_moving_avg_kernel_scratch(%arg0: i32, %arg1: memref<2x128xf32, #tpu.memory_space<vmem>>, %arg2: memref<2x128xf32, #tpu.memory_space<vmem>>, %arg3: memref<2x160xf32, #tpu.memory_space<vmem>>) attributes {dimension_semantics = [#tpu.dimension_semantics<parallel>], iteration_bounds = array<i64: 1>, scalar_prefetch = 0 : i64, scratch_operands = 1 : i64, tpu.core_type = #tpu.core_type<tc>, window_params = [{transform_indices = @transform_0, window_bounds = array<i64: 2, 128>}, {transform_indices = @transform_1, window_bounds = array<i64: 2, 128>}]} {
    %c0 = arith.constant 0 : index
    %c0_0 = arith.constant 0 : index
    %0 = vector.load %arg1[%c0, %c0_0] : memref<2x128xf32, #tpu.memory_space<vmem>>, vector<2x128xf32>
    %c0_1 = arith.constant 0 : index
    %c16 = arith.constant 16 : index
    %1 = vector.load %arg3[%c0_1, %c16] : memref<2x160xf32, #tpu.memory_space<vmem>>, vector<2x128xf32>
    tpu.vector_store %arg3[%c0_1, %c16], %0 {strides = array<i32>} : memref<2x160xf32, #tpu.memory_space<vmem>>, vector<2x128xf32>,
    %c0_2 = arith.constant 0 : index
    %c0_3 = arith.constant 0 : index
    %2 = vector.load %arg1[%c0_2, %c0_3] : memref<2x128xf32, #tpu.memory_space<vmem>>, vector<2x8xf32>
    %c0_4 = arith.constant 0 : index
    %c120 = arith.constant 120 : index
    %3 = vector.load %arg1[%c0_4, %c120] : memref<2x128xf32, #tpu.memory_space<vmem>>, vector<2x8xf32>
    %c0_5 = arith.constant 0 : index
    %c0_6 = arith.constant 0 : index
    %4 = vector.load %arg3[%c0_5, %c0_6] : memref<2x160xf32, #tpu.memory_space<vmem>>, vector<2x8xf32>
    tpu.vector_store %arg3[%c0_5, %c0_6], %2 {strides = array<i32>} : memref<2x160xf32, #tpu.memory_space<vmem>>, vector<2x8xf32>,
    %c0_7 = arith.constant 0 : index
    %c144 = arith.constant 144 : index
    %5 = vector.load %arg3[%c0_7, %c144] : memref<2x160xf32, #tpu.memory_space<vmem>>, vector<2x8xf32>
    tpu.vector_store %arg3[%c0_7, %c144], %3 {strides = array<i32>} : memref<2x160xf32, #tpu.memory_space<vmem>>, vector<2x8xf32>,
    %c0_8 = arith.constant 0 : index
    %c8 = arith.constant 8 : index
    %6 = vector.load %arg3[%c0_8, %c8] : memref<2x160xf32, #tpu.memory_space<vmem>>, vector<2x8xf32>
    tpu.vector_store %arg3[%c0_8, %c8], %2 {strides = array<i32>} : memref<2x160xf32, #tpu.memory_space<vmem>>, vector<2x8xf32>,
    %c0_9 = arith.constant 0 : index
    %c152 = arith.constant 152 : index
    %7 = vector.load %arg3[%c0_9, %c152] : memref<2x160xf32, #tpu.memory_space<vmem>>, vector<2x8xf32>
    tpu.vector_store %arg3[%c0_9, %c152], %3 {strides = array<i32>} : memref<2x160xf32, #tpu.memory_space<vmem>>, vector<2x8xf32>,
    %c0_10 = arith.constant 0 : index
    %c0_11 = arith.constant 0 : index
    %8 = vector.load %arg3[%c0_10, %c0_11] : memref<2x160xf32, #tpu.memory_space<vmem>>, vector<2x160xf32>
    %9 = vector.extract_strided_slice %8 {offsets = [0, 0], sizes = [2, 152], strides = [1, 1]} : vector<2x160xf32> to vector<2x152xf32>
    %10 = vector.extract_strided_slice %8 {offsets = [0, 8], sizes = [2, 152], strides = [1, 1]} : vector<2x160xf32> to vector<2x152xf32>
    %11 = arith.addf %9, %10 : vector<2x152xf32>
    %12 = vector.extract_strided_slice %11 {offsets = [0, 0], sizes = [2, 136], strides = [1, 1]} : vector<2x152xf32> to vector<2x136xf32>
    %13 = vector.extract_strided_slice %11 {offsets = [0, 16], sizes = [2, 136], strides = [1, 1]} : vector<2x152xf32> to vector<2x136xf32>
    %14 = arith.addf %12, %13 : vector<2x136xf32>
    %15 = vector.extract_strided_slice %8 {offsets = [0, 0], sizes = [2, 128], strides = [1, 1]} : vector<2x160xf32> to vector<2x128xf32>
    %16 = vector.extract_strided_slice %14 {offsets = [0, 8], sizes = [2, 128], strides = [1, 1]} : vector<2x136xf32> to vector<2x128xf32>
    %17 = arith.addf %15, %16 : vector<2x128xf32>
    %cst = arith.constant 2.000000e-01 : f32
    %18 = vector.broadcast %cst : f32 to vector<2x128xf32>
    %19 = arith.mulf %17, %18 : vector<2x128xf32>
    %c0_12 = arith.constant 0 : index
    %c0_13 = arith.constant 0 : index
    %20 = vector.load %arg2[%c0_12, %c0_13] : memref<2x128xf32, #tpu.memory_space<vmem>>, vector<2x128xf32>
    tpu.vector_store %arg2[%c0_12, %c0_13], %19 {strides = array<i32>} : memref<2x128xf32, #tpu.memory_space<vmem>>, vector<2x128xf32>,
    return
  }
  func.func @transform_0(%arg0: i32) -> (i32, i32) {
    %c0_i32 = arith.constant 0 : i32
    %c0_i32_0 = arith.constant 0 : i32
    return %arg0, %c0_i32 : i32, i32
  }
  func.func @transform_1(%arg0: i32) -> (i32, i32) {
    %c0_i32 = arith.constant 0 : i32
    %c0_i32_0 = arith.constant 0 : i32
    return %arg0, %c0_i32 : i32, i32
  }
}

</mosaic_0001>

<bundles_post_ra>
// kernel: tpu_custom_call.1
= control target key start
LH: loop header
LB: loop body
LE: loop exit
PB: predicated region body
PF: predicated region fallthrough
CT: control target
= control target key end

     0   :  { %6 = vsyncpa [#allocation3], 0  ;;  %s185_s0 = inlined_call_operand.hbm [shape: f32[2,128], index: 0, kind: input, shape index: {}]   ;;  %s186_s1 = inlined_call_operand.hbm [shape: f32[2,128], index: 1, kind: output, shape index: {}]  }
   0x1   :  { %7 = vsyncpa [#allocation4], 0  ;;  %s143_s6 = smov [#allocation2]   ;;  %s95_s10 = scalar_lea.hbm %s185_s0, 32 }
   0x2   :  { %s14_s7 = sshll.u32 %s143_s6, 4  ;;  %p96_p0 = scmp.ne.s32.totalorder %s185_s0, %s95_s10  ;;  %s15_s7 = int_to_ptr.vmem [resolvable:$true] %s14_s7 }
   0x3   :  { %p99_p1 = scmp.lt.u32.totalorder %s95_s10, %s185_s0 }
   0x5   :  { %p101_p2 = pnand %p99_p1, %p96_p0 }
   0x7   :  { %104 = shalt.err (!%p101_p2)
}
   0x8   :  { %s105_s15 = scalar_lea.vmem %s15_s7, 32  ;;  %p110_p4 = scmp.lt.s32.totalorder %s15_s7, %s15_s7 }
   0x9   :  { %p106_p3 = scmp.ne.s32.totalorder %s15_s7, %s105_s15  ;;  %p111_p5 = scmp.lt.s32.totalorder %s105_s15, %s105_s15 }
   0xb   :  { %p112_p6 = por %p111_p5, %p110_p4 }
   0xd   :  { %p113_p7 = pnand %p112_p6, %p106_p3 }
   0xf   :  { %116 = shalt.err (!%p113_p7)
}
  0x10   :  { %17 = dma.hbm_to_vmem [thread:$0]  %s185_s0, 32, %s15_s7, [#allocation3]  }
  0x11   :  { %139 = dma.done.wait [#allocation3], 32  }
  0x12   :  { %140 = vsyncadd [#allocation3], 4294967264  ;;  %v21_v0 = vld [vmem:[#allocation2] sm:$0x3]  ;;  %s144_s18 = smov 8   ;;  %s145_s19 = smov 16  }
  0x13   :  { %23 = vrot.lane.b32.xlu0 %v21_v0, %s144_s18  ;;  %vm26_vm0 = vcmask 64512   ;;  %vm36_vm1 = vcmask 130048   ;;  %s146_s20 = smov 120   ;;  %vm45_vm2 = vcmask 982016   ;;  %s147_s0 = smov 112   ;;  %vm57_vm3 = vcmask 916480  }
  0x14   :  { %s148_s21 = smov [#allocation5]  }
  0x15   :  { %s80_s22 = sshll.u32 %s148_s21, 4  ;;  %s81_s22 = int_to_ptr.vmem [resolvable:$true] %s80_s22 }
  0x16   :  { %s117_s23 = scalar_lea.vmem %s81_s22, 32  ;;  %p122_p9 = scmp.lt.s32.totalorder %s81_s22, %s81_s22 }
  0x17   :  { %28 = vrot.lane.b32.xlu0 %v21_v0, %s145_s19  ;;  %p118_p8 = scmp.ne.s32.totalorder %s81_s22, %s117_s23  ;;  %p123_p10 = scmp.lt.s32.totalorder %s117_s23, %s117_s23 }
  0x19   :  { %p124_p11 = por %p123_p10, %p122_p9 }
  0x1b   :  { %p125_p12 = pnand %p124_p11, %p118_p8 }
  0x85   :  { %v24_v1 = vpop.permute.xlu0 %23 }
  0x86   :  { %v27_v4 = vsel %vm26_vm0, %v21_v0, %v24_v1 }
  0x89   :  { %v29_v2 = vpop.permute.xlu0 %28 }
  0x8a   :  { %v31_v3 = vsel %vm26_vm0, %v24_v1, %v29_v2  ;;  %v37_v5 = vsel %vm36_vm1, %v27_v4, %v29_v2 }
  0x8b   :  { %33 = vrot.lane.b32.xlu1 %v31_v3, %s145_s19 }
  0x8f   :  { %41 = vrot.lane.b32.xlu1 %v37_v5, %s146_s20 }
  0xfd   :  { %v34_v6 = vpop.permute.xlu1 %33 }
  0xfe   :  { %v38_v7 = vsel %vm36_vm1, %v29_v2, %v34_v6 }
  0xff   :  { %43 = vrot.lane.b32.xlu0 %v38_v7, %s146_s20 }
 0x101   :  { %v42_v8 = vpop.permute.xlu1 %41 }
 0x171   :  { %v44_v9 = vpop.permute.xlu0 %43 }
 0x172   :  { %v46_v10 = vsel %vm45_vm2, %v42_v8, %v44_v9  ;;  %v50_v11 = vadd.f32 %v44_v9, %v38_v7 }
 0x173   :  { %v49_v12 = vadd.f32 %v46_v10, %v37_v5 }
 0x174   :  { %55 = vrot.lane.b32.xlu0 %v50_v11, %s147_s0 }
 0x175   :  { %53 = vrot.lane.b32.xlu1 %v49_v12, %s147_s0 }
 0x1e6   :  { %v56_v13 = vpop.permute.xlu0 %55 }
 0x1e7   :  { %v62_v14 = vadd.f32 %v56_v13, %v50_v11  ;;  %v54_v15 = vpop.permute.xlu1 %53 }
 0x1e8   :  { %v58_v16 = vsel %vm57_vm3, %v54_v15, %v56_v13 }
 0x1e9   :  { %v61_v17 = vadd.f32 %v58_v16, %v49_v12  ;;  %67 = vrot.lane.b32.xlu0 %v62_v14, %s146_s20 }
 0x1eb   :  { %65 = vrot.lane.b32.xlu1 %v61_v17, %s146_s20 }
 0x25b   :  { %v68_v18 = vpop.permute.xlu0 %67 }
 0x25d   :  { %v66_v19 = vpop.permute.xlu1 %65 }
 0x25e   :  { %v69_v20 = vsel %vm45_vm2, %v66_v19, %v68_v18 }
 0x25f   :  { %v71_v21 = vadd.f32 %v69_v20, %v37_v5 }
 0x261   :  { %v72_v22 = vmul.f32 0.2, %v71_v21 }
 0x263   :  { %73 = vst [vmem:[#allocation5] sm:$0x3] %v72_v22 }
 0x264   :  { %128 = shalt.err (!%p125_p12)
}
 0x265   :  { %s129_s26 = scalar_lea.hbm %s186_s1, 32 }
 0x266   :  { %p130_p13 = scmp.ne.s32.totalorder %s186_s1, %s129_s26  ;;  %p133_p0 = scmp.lt.u32.totalorder %s129_s26, %s186_s1 }
 0x268   :  { %p135_p1 = pnand %p133_p0, %p130_p13 }
 0x26a   :  { %138 = shalt.err (!%p135_p1)
}
 0x26b   :  { %83 = dma.vmem_to_hbm [thread:$0]  %s81_s22, 32, %s186_s1, [#allocation4]  }
 0x26c   :  { %141 = dma.done.wait [#allocation4], 32  }
 0x26d   :  { %142 = vsyncadd [#allocation4], 4294967264 }
 0x26e   :  { %87 = vsyncpa [#allocation3], 1 }
 0x26f   :  { %88 = vsyncpa [#allocation4], 1 }

// kernel: tpu_custom_call.1
= control target key start
LH: loop header
LB: loop body
LE: loop exit
PB: predicated region body
PF: predicated region fallthrough
CT: control target
= control target key end

     0   :  { %6 = vsyncpa [#allocation4], 0  ;;  %s208_s0 = inlined_call_operand.hbm [shape: f32[2,128], index: 0, kind: input, shape index: {}]   ;;  %s209_s1 = inlined_call_operand.hbm [shape: f32[2,128], index: 1, kind: output, shape index: {}]  }
   0x1   :  { %7 = vsyncpa [#allocation5], 0  ;;  %s165_s6 = smov [#allocation3]   ;;  %s117_s10 = scalar_lea.hbm %s208_s0, 32 }
   0x2   :  { %s14_s7 = sshll.u32 %s165_s6, 4  ;;  %p118_p0 = scmp.ne.s32.totalorder %s208_s0, %s117_s10  ;;  %s15_s7 = int_to_ptr.vmem [resolvable:$true] %s14_s7 }
   0x3   :  { %p121_p1 = scmp.lt.u32.totalorder %s117_s10, %s208_s0 }
   0x5   :  { %p123_p2 = pnand %p121_p1, %p118_p0 }
   0x7   :  { %126 = shalt.err (!%p123_p2)
}
   0x8   :  { %s127_s15 = scalar_lea.vmem %s15_s7, 32  ;;  %p132_p4 = scmp.lt.s32.totalorder %s15_s7, %s15_s7 }
   0x9   :  { %p128_p3 = scmp.ne.s32.totalorder %s15_s7, %s127_s15  ;;  %p133_p5 = scmp.lt.s32.totalorder %s127_s15, %s127_s15 }
   0xb   :  { %p134_p6 = por %p133_p5, %p132_p4 }
   0xd   :  { %p135_p7 = pnand %p134_p6, %p128_p3 }
   0xf   :  { %138 = shalt.err (!%p135_p7)
}
  0x10   :  { %17 = dma.hbm_to_vmem [thread:$0]  %s208_s0, 32, %s15_s7, [#allocation4]  }
  0x11   :  { %161 = dma.done.wait [#allocation4], 32  }
  0x12   :  { %162 = vsyncadd [#allocation4], 4294967264  ;;  %v47_v0 = vlaneseq  ;;  %v166_v1 = vmov 1983009808   ;;  %v40_v7 = vld [vmem:[#allocation3] sm:$0x3] }
  0x13   :  { %v45_v2 = vunpack.c.l.s4 %v166_v1  ;;  %v107_v6 = vld.sshfl [vmem:[#allocation3] sm:$0x3 pattern:$0x76325410]  ;;  %s167_s18 = smov 16   ;;  %s168_s19 = smov 8  }
  0x14   :  { %v48_v3 = vshrl.u32 %v47_v0, 7  ;;  %30 = vrot.lane.b32.xlu0 %v107_v6, %s167_s18  ;;  %s169_s20 = smov 24   ;;  %s170_s21 = smov 32   ;;  %vm36_vm0 = vcmask 1041536   ;;  %vm37_vm1 = vcmask 125954   ;;  %vm33_vm2 = vcmask 130048  }
  0x15   :  { %v46_v4 = vunpack.c.0.s8 %v45_v2  ;;  %vm38_vm3 = vmor %vm37_vm1, %vm36_vm0  ;;  %vm41_vm4 = vcmask 58368   ;;  %vm54_vm5 = vcmask 189568   ;;  %vm59_vm6 = vcmask 123968   ;;  %s171_s0 = smov 120   ;;  %s172_s22 = smov 112  }
  0x16   :  { %vm64_vm7 = vcmask 255168   ;;  %vm71_vm8 = vcmask 982016   ;;  %vm79_vm9 = vcmask 916480   ;;  %s173_s23 = smov [#allocation6]  }
  0x17   :  { %v49_v5 = vsub.s32 %v46_v4, %v48_v3  ;;  %s98_s24 = sshll.u32 %s173_s23, 4  ;;  %s99_s24 = int_to_ptr.vmem [resolvable:$true] %s98_s24 }
  0x18   :  { %s139_s25 = scalar_lea.vmem %s99_s24, 32  ;;  %p144_p9 = scmp.lt.s32.totalorder %s99_s24, %s99_s24 }
  0x19   :  { %v50_v8 = vrot.slane %v40_v7, %v49_v5  ;;  %p140_p8 = scmp.ne.s32.totalorder %s99_s24, %s139_s25  ;;  %p145_p10 = scmp.lt.s32.totalorder %s139_s25, %s139_s25 }
  0x1b   :  { %56 = vrot.lane.b32.xlu1 %v50_v8, %s168_s19  ;;  %51 = vrot.lane.b32.xlu0 %v50_v8, %s169_s20  ;;  %p146_p11 = por %p145_p10, %p144_p9 }
  0x1d   :  { %p147_p12 = pnand %p146_p11, %p140_p8 }
  0x1f   :  { %61 = vrot.lane.b32.xlu1 %v50_v8, %s170_s21 }
  0x86   :  { %v31_v9 = vpop.permute.xlu0 %30 }
  0x87   :  { %v32_v10 = vrot.slane %v31_v9, 6 }
  0x89   :  { %v34_v12 = vsel %vm33_vm2, %v32_v10, %v31_v9 }
  0x8a   :  { %39 = vst.msk [vmem:[#allocation2] sm:$0xf] %vm38_vm3, %v34_v12 }
  0x8b   :  { %42 = vst.msk [vmem:[#allocation2] sm:$0x3] %vm41_vm4, %v40_v7 }
  0x8d   :  { %v57_v11 = vpop.permute.xlu1 %56  ;;  %v52_v13 = vpop.permute.xlu0 %51 }
  0x8e   :  { %55 = vst.msk [vmem:[#allocation2 + $0x2] sm:$0x3] %vm54_vm5, %v52_v13 }
  0x8f   :  { %60 = vst.msk [vmem:[#allocation2] sm:$0x3] %vm59_vm6, %v57_v11 }
  0x91   :  { %v62_v14 = vpop.permute.xlu1 %61 }
  0x92   :  { %65 = vst.msk [vmem:[#allocation2 + $0x2] sm:$0x3] %vm64_vm7, %v62_v14 }
  0x99   :  { %v66_v15 = vld [vmem:[#allocation2] sm:$0xf] }
  0x9a   :  { %68 = vrot.lane.b32.xlu0 %v66_v15, %s171_s0 }
 0x10c   :  { %v69_v16 = vpop.permute.xlu0 %68 }
 0x10d   :  { %v70_v17 = vrot.slane %v69_v16, 2 }
 0x10f   :  { %v72_v18 = vsel %vm71_vm8, %v69_v16, %v70_v17 }
 0x110   :  { %v74_v19 = vadd.f32 %v72_v18, %v66_v15 }
 0x112   :  { %76 = vrot.lane.b32.xlu1 %v74_v19, %s172_s22 }
 0x184   :  { %v77_v20 = vpop.permute.xlu1 %76 }
 0x185   :  { %v78_v21 = vrot.slane %v77_v20, 2 }
 0x187   :  { %v80_v22 = vsel %vm79_vm9, %v77_v20, %v78_v21 }
 0x188   :  { %v82_v23 = vadd.f32 %v80_v22, %v74_v19 }
 0x18a   :  { %84 = vrot.lane.b32.xlu0 %v82_v23, %s171_s0 }
 0x1fc   :  { %v85_v24 = vpop.permute.xlu0 %84 }
 0x1fd   :  { %v86_v25 = vrot.slane %v85_v24, 2 }
 0x1ff   :  { %v87_v26 = vsel %vm71_vm8, %v85_v24, %v86_v25 }
 0x200   :  { %v89_v27 = vadd.f32 %v87_v26, %v66_v15 }
 0x202   :  { %v90_v28 = vmul.f32 0.2, %v89_v27 }
 0x204   :  { %91 = vst [vmem:[#allocation6] sm:$0x3] %v90_v28 }
 0x205   :  { %150 = shalt.err (!%p147_p12)
}
 0x206   :  { %s151_s28 = scalar_lea.hbm %s209_s1, 32 }
 0x207   :  { %p152_p13 = scmp.ne.s32.totalorder %s209_s1, %s151_s28  ;;  %p155_p0 = scmp.lt.u32.totalorder %s151_s28, %s209_s1 }
 0x209   :  { %p157_p1 = pnand %p155_p0, %p152_p13 }
 0x20b   :  { %160 = shalt.err (!%p157_p1)
}
 0x20c   :  { %101 = dma.vmem_to_hbm [thread:$0]  %s99_s24, 32, %s209_s1, [#allocation5]  }
 0x20d   :  { %163 = dma.done.wait [#allocation5], 32  }
 0x20e   :  { %164 = vsyncadd [#allocation5], 4294967264 }
 0x20f   :  { %105 = vsyncpa [#allocation4], 1 }
 0x210   :  { %106 = vsyncpa [#allocation5], 1 }

</bundles_post_ra>
